<compile_context>
chip_gen: v6e
topology: v6e:2x2x1
jax: 0.10.0
libtpu: 0.0.40
codegen_flags: <defaults>
</compile_context>

<pallas_src>
import functools

import jax
import jax.numpy as jnp
from jax.experimental import pallas as pl
from jax.experimental.pallas import tpu as pltpu

INPUT_SIZE = 10
OUTPUT_SIZE = 5
LANE = 128     # TPU lane width (last dim)
SUBLANE = 8    # f32 sublane count (second-to-last dim)


def _round_up(n, m):
    return ((n + m - 1) // m) * m


def linear_kernel(x_ref, wt_ref, o_ref):
    # x_ref : (B_pad, K_pad)      f32   (ones-column carries the bias)
    # wt_ref: (K_pad, out_pad)    f32   (pre-transposed weight, bias row folded in)
    # o_ref : (B_pad, out_pad)    f32   (lane/sublane-dense -> unmasked stores)
    o_ref[...] = jnp.dot(
        x_ref[...], wt_ref[...], preferred_element_type=jnp.float32
    ).astype(o_ref.dtype)


def prepare_params(weight, bias):
    """One-time prep (model init): transpose, fold bias in, pad to tile-aligned shapes.

    weight: (out_f, in_f) torch layout; bias: (out_f,)
    Returns wt_aug: (K_pad, out_pad) with rows [0:in_f]=W^T, row [in_f]=bias, rest zero.
    """
    out_f, in_f = weight.shape
    k_pad = _round_up(in_f + 1, SUBLANE)      # +1 for the bias row -> 16
    out_pad = _round_up(out_f, LANE)          # -> 128
    wt_aug = jnp.zeros((k_pad, out_pad), weight.dtype)
    wt_aug = wt_aug.at[:in_f, :out_f].set(weight.T)
    wt_aug = wt_aug.at[in_f, :out_f].set(bias)
    return wt_aug


def small_model_forward(x, wt_aug, out_f):
    """x: (B, in_f) f32; wt_aug: (K_pad, out_pad) from prepare_params; out_f static."""
    B, in_f = x.shape
    k_pad, out_pad = wt_aug.shape
    b_pad = _round_up(B, SUBLANE)

    # Augment x: zero-pad to (B_pad, K_pad) and set the bias column to ones.
    # (Zero rows / zero lanes contribute nothing to the dot product.)
    x_aug = jnp.zeros((b_pad, k_pad), x.dtype)
    x_aug = x_aug.at[:B, :in_f].set(x)
    x_aug = x_aug.at[:B, in_f].set(1.0)

    vmem = pl.BlockSpec(memory_space=pltpu.MemorySpace.VMEM)

    y_pad = pl.pallas_call(
        linear_kernel,
        out_shape=jax.ShapeDtypeStruct((b_pad, out_pad), x.dtype),
        in_specs=[vmem, vmem],
        out_specs=vmem,
    )(x_aug, wt_aug)

    # Downstream here needs the exact (B, out_f) result; accept this tiny slice.
    return y_pad[:B, :out_f]


if __name__ == "__main__":
    key = jax.random.PRNGKey(0)
    kx, kw, kb = jax.random.split(key, 3)

    batch = 8
    x = jax.random.normal(kx, (batch, INPUT_SIZE), dtype=jnp.float32)

    # Deterministic parameter init mimicking torch.nn.Linear's
    # uniform(-1/sqrt(in), 1/sqrt(in)).
    bound = 1.0 / (INPUT_SIZE ** 0.5)
    weight = jax.random.uniform(
        kw, (OUTPUT_SIZE, INPUT_SIZE), dtype=jnp.float32, minval=-bound, maxval=bound
    )
    bias = jax.random.uniform(
        kb, (OUTPUT_SIZE,), dtype=jnp.float32, minval=-bound, maxval=bound
    )

    # One-time parameter prep, outside the per-call forward path.
    wt_aug = jax.block_until_ready(prepare_params(weight, bias))

    fwd = jax.jit(functools.partial(small_model_forward, out_f=OUTPUT_SIZE))
    out = jax.block_until_ready(fwd(x, wt_aug))

    # Cross-check against pure-JAX reference.
    ref = x @ weight.T + bias
    assert out.shape == (batch, OUTPUT_SIZE)
    assert jnp.allclose(out, ref, atol=1e-5, rtol=1e-5)

    print("KERNEL_OK")
</pallas_src>

<mosaic_0001>
module attributes {stable_mosaic.version = 11 : i64} {
  func.func @linear_kernel(%arg0: memref<8x16xf32, #tpu.memory_space<vmem>>, %arg1: memref<16x128xf32, #tpu.memory_space<vmem>>, %arg2: memref<8x128xf32, #tpu.memory_space<vmem>>) attributes {dimension_semantics = [], scalar_prefetch = 0 : i64, scratch_operands = 0 : i64, tpu.core_type = #tpu.core_type<tc>} {
    %c0 = arith.constant 0 : index
    %c0_0 = arith.constant 0 : index
    %0 = vector.load %arg0[%c0, %c0_0] : memref<8x16xf32, #tpu.memory_space<vmem>>, vector<8x16xf32>
    %c0_1 = arith.constant 0 : index
    %c0_2 = arith.constant 0 : index
    %1 = vector.load %arg1[%c0_1, %c0_2] : memref<16x128xf32, #tpu.memory_space<vmem>>, vector<16x128xf32>
    %cst = arith.constant dense<0.000000e+00> : vector<8x128xf32>
    %2 = tpu.matmul %0, %1, %cst {dimension_numbers = #tpu.dot_dimension_numbers<[1], [0], [0], [1], [0, 0, 1, 1], [], []>} : vector<8x16xf32>, vector<16x128xf32>, vector<8x128xf32> -> vector<8x128xf32>
    %c0_3 = arith.constant 0 : index
    %c0_4 = arith.constant 0 : index
    %3 = vector.load %arg2[%c0_3, %c0_4] : memref<8x128xf32, #tpu.memory_space<vmem>>, vector<8x128xf32>
    tpu.vector_store %arg2[%c0_3, %c0_4], %2 {strides = array<i32>} : memref<8x128xf32, #tpu.memory_space<vmem>>, vector<8x128xf32>,
    return
  }
}

</mosaic_0001>

<bundles_post_ra>
// kernel: small_model_forward.1
= control target key start
LH: loop header
LB: loop body
LE: loop exit
PB: predicated region body
PF: predicated region fallthrough
CT: control target
= control target key end

     0   :  { %v140_v1 = vmov 0.0   ;;  %vm141_vm0 = vmmov 0   ;;  %s170_s0 = inlined_call_operand.vmem [shape: f32[8,16], index: 0, kind: input, shape index: {}]   ;;  %s171_s1 = inlined_call_operand.vmem [shape: f32[16,128], index: 1, kind: input, shape index: {}]   ;;  %s172_s2 = inlined_call_operand.hbm [shape: f32[8,128], index: 2, kind: output, shape index: {}]  }
   0x1   :  { %v14_v0 = vld [vmem:[%s171_s1 + $0x8] sm:$0xff]  ;;  %108 = vmatprep.subr.mxu0 %v140_v1  ;;  %v13_v2 = vld [vmem:[%s171_s1] sm:$0xff]  ;;  %112 = vmatprep.mubr.msk.f32.mxu0 %vm141_vm0, %v140_v1 }
   0x2   :  { %7 = vsyncpa [#allocation3], 0  ;;  %109 = vmatpush3.msra.mxu0 %v14_v0  ;;  %v12_v3 = vld [vmem:[%s170_s0] sm:$0xff]  ;;  %vm15_vm1 = vcmask 130048   ;;  %s142_s15 = smov [#allocation2]  }
   0x3   :  { %110 = vmatprep.subr.mxu0 %v140_v1  ;;  %s96_s16 = sshll.u32 %s142_s15, 4  ;;  %s97_s16 = int_to_ptr.vmem [resolvable:$true] %s96_s16 }
   0x4   :  { %111 = vmatpush3.msra.mxu0 %v13_v2  ;;  %s118_s17 = scalar_lea.vmem %s97_s16, 128  ;;  %p123_p1 = scmp.lt.s32.totalorder %s97_s16, %s97_s16 }
   0x5   :  { %113 = vmatmul.mubr.msk.f32.vlgmr.msra.gmra.mxu0 %vm15_vm1, %v12_v3  ;;  %p119_p0 = scmp.ne.s32.totalorder %s97_s16, %s118_s17  ;;  %p124_p2 = scmp.lt.s32.totalorder %s118_s17, %s118_s17 }
   0x7   :  { %p125_p3 = por %p124_p2, %p123_p1 }
   0x9   :  { %p126_p4 = pnand %p125_p3, %p119_p0 }
  0xc5   :  { %v85_v4 = vpop.f32.mrf.mxu0 }
  0xc6   :  { %89 = vst [vmem:[#allocation2] sm:$0xff] %v85_v4 }
  0xc7   :  { %v114_v5 = vpop.f32.mrf.mxu0 }
  0xc8   :  { %129 = shalt.err (!%p126_p4)
}
  0xc9   :  { %99 = dma.vmem_to_hbm [thread:$0]  %s97_s16, 128, %s172_s2, [#allocation3]  }
  0xca   :  { %138 = dma.done.wait [#allocation3], 128  }
  0xcb   :  { %139 = vsyncadd [#allocation3], 4294967168 }
  0xcc   :  { %103 = vsyncpa [#allocation3], 1 }

</bundles_post_ra>
